<compile_context>
chip_gen: v5e
topology: v5e:2x2
jax: 0.10.0
libtpu: 0.0.40
codegen_flags: <defaults>
</compile_context>

<pallas_src>
import functools

import jax
import jax.numpy as jnp
from jax.experimental import pallas as pl
from jax.experimental.pallas import tpu as pltpu


def _round_up(x, m):
    return ((x + m - 1) // m) * m


# ---------------------------------------------------------------------------
# Kernel
# ---------------------------------------------------------------------------
def decoder_kernel(x_ref, w1_ref, mb_ref, w2_ref, b2_ref, w3_ref, b3_ref,
                   out_ref, *, k, ew_dtype):
    """One row-tile of the fused two-head MLP, all K modes, packed output.

    x_ref  : (TM, D)            input rows
    w1_ref : (D, 2H)            fused first layer  [W1_loc | W1_pi]
    mb_ref : (K, 2H)   f32      per-mode bias  e_m @ W1 + b1
    w2_ref : (2H, G)            block-diag second layer, G = roundup(2D,128)
    b2_ref : (1, G)    f32
    w3_ref : (K, G, Lp)         third layer, mode m's columns placed at lanes
                                [m*(F2+1), m*(F2+1)+F2]  (loc | pi), zeros elsewhere
    b3_ref : (1, Lp)   f32      per-mode biases placed at the same lane offsets
    out_ref: (TM, Lp)  f32      compact lane-dense output slab
    """
    tm = x_ref.shape[0]
    cdt = w2_ref.dtype

    # ---- Layer 1 (shared across all modes): one wide MXU matmul ------------
    h0 = jnp.dot(x_ref[...], w1_ref[...],
                 preferred_element_type=jnp.float32)             # (TM, 2H) f32
    h0 = h0.astype(ew_dtype)
    mb = mb_ref[...].astype(ew_dtype)                            # (K, 2H)

    # ---- Per-mode bias + ReLU, modes stacked along rows ---------------------
    h_all = jnp.maximum(h0[None, :, :] + mb[:, None, :], 0.0)    # (K, TM, 2H)
    h_all = h_all.astype(cdt).reshape(k * tm, h0.shape[-1])      # (K*TM, 2H)

    # ---- Layer 2: single big weight-stationary matmul ------------------------
    g = jnp.dot(h_all, w2_ref[...],
                preferred_element_type=jnp.float32)              # (K*TM, G) f32
    g = jnp.maximum(g.astype(ew_dtype) + b2_ref[...].astype(ew_dtype), 0.0)
    g = g.astype(cdt)

    # ---- Layer 3: K accumulating matmuls with lane-placed per-mode weights ---
    # The disjoint lane placement packs all K modes into one compact slab, so
    # the packing rides the MXU accumulation for free.
    acc = jnp.zeros((tm, out_ref.shape[-1]), jnp.float32)
    for m in range(k):                                           # K small, static
        gm = g[m * tm:(m + 1) * tm, :]                           # (TM, G)
        acc = acc + jnp.dot(gm, w3_ref[m],
                            preferred_element_type=jnp.float32)  # (TM, Lp)
    out_ref[...] = (acc + b3_ref[...]).astype(out_ref.dtype)


# ---------------------------------------------------------------------------
# Parameter fusion (done once in the wrapper; tiny arrays)
# ---------------------------------------------------------------------------
def _fuse_params(params, D, H, F2, k, compute_dtype):
    H2 = 2 * H                          # fused first-layer width (loc | pi)
    G = _round_up(2 * D, 128)           # padded second-layer output width
    F2p1 = F2 + 1
    Lp = _round_up(k * F2p1, 128)       # compact packed output width

    w1f = jnp.concatenate([params["w1l"], params["w1p"]], axis=1)       # (D, 2H)
    b1f = jnp.concatenate([params["b1l"], params["b1p"]], axis=1)       # (1, 2H)
    # Fold the mode-embedding add through the linear layer (exact up to fp
    # rounding):  (x + e) @ W1 + b1 = x @ W1 + (e @ W1 + b1)
    mode_bias = (params["mode_embed"] @ w1f + b1f).astype(jnp.float32)  # (K, 2H)

    w2f = jnp.zeros((H2, G), jnp.float32)
    w2f = w2f.at[:H, :D].set(params["w2l"]).at[H:, D:2 * D].set(params["w2p"])
    b2f = jnp.zeros((1, G), jnp.float32)
    b2f = b2f.at[:, :D].set(params["b2l"][0]).at[:, D:2 * D].set(params["b2p"][0])

    # Per-mode layer-3 weights with the mode's outputs pre-placed at disjoint
    # lane offsets -> kernel output is a compact (TM, Lp) slab.
    w3p = jnp.zeros((k, G, Lp), jnp.float32)
    b3p = jnp.zeros((1, Lp), jnp.float32)
    for m in range(k):
        off = m * F2p1
        w3p = w3p.at[m, :D, off:off + F2].set(params["w3l"])
        w3p = w3p.at[m, D:2 * D, off + F2].set(params["w3p"][:, 0])
        b3p = b3p.at[0, off:off + F2].set(params["b3l"][0])
        b3p = b3p.at[0, off + F2].set(params["b3p"][0, 0])

    return (w1f.astype(compute_dtype), mode_bias,
            w2f.astype(compute_dtype), b2f,
            w3p.astype(compute_dtype), b3p, G, Lp)


# ---------------------------------------------------------------------------
# Forward wrapper
# ---------------------------------------------------------------------------
def multimodal_decoder_forward(x, params, k, future_steps, *, tm=512,
                               compute_dtype=jnp.float32,
                               elementwise_dtype=None):
    """x: (B, N, D).  Returns (loc (B,N,k,future_steps,2), pi (B,N,k))."""
    B, N, D = x.shape
    F2 = future_steps * 2
    F2p1 = F2 + 1
    H = params["w1l"].shape[1]

    # Elementwise dtype: bf16 on chips with a bf16 VPU (v6e/v7x) when running
    # the bf16 matmul path; f32 otherwise (v5e/v4 have no bf16 VALU).
    if elementwise_dtype is None:
        elementwise_dtype = jnp.float32
        if compute_dtype == jnp.bfloat16:
            try:
                kind = jax.devices()[0].device_kind.lower()
                if not any(v in kind for v in ("v2", "v3", "v4", "v5")):
                    elementwise_dtype = jnp.bfloat16
            except Exception:
                pass

    w1f, mb, w2f, b2f, w3p, b3p, G, Lp = _fuse_params(
        params, D, H, F2, k, compute_dtype)

    BN = B * N
    x2 = x.reshape(BN, D).astype(compute_dtype)

    # Row tiling: big tiles for MXU occupancy, evened out to minimize padding,
    # and >=2 (even) grid steps when there is enough work so both TensorCores
    # of a 2-TC chip (v7x) stay busy.
    n_tiles = max(1, pl.cdiv(BN, tm))
    if n_tiles == 1 and BN >= 256:
        n_tiles = 2
    if n_tiles > 1 and n_tiles % 2 == 1:
        n_tiles += 1
    tm_eff = _round_up(pl.cdiv(BN, n_tiles), 8)
    BN_pad = _round_up(BN, tm_eff)
    if BN_pad != BN:
        x2 = jnp.pad(x2, ((0, BN_pad - BN), (0, 0)))
    grid = (BN_pad // tm_eff,)

    def full_spec(a):
        nd = a.ndim
        return pl.BlockSpec(a.shape, lambda i, _nd=nd: (0,) * _nd)

    kernel = functools.partial(decoder_kernel, k=k, ew_dtype=elementwise_dtype)
    weights = (w1f, mb, w2f, b2f, w3p, b3p)

    flops = BN_pad * (2 * D * 2 * H + k * (2 * (2 * H) * G + 2 * G * Lp))
    bytes_accessed = (int(x2.size) * x2.dtype.itemsize
                      + sum(int(a.size) * a.dtype.itemsize for a in weights)
                      + BN_pad * Lp * 4)

    out = pl.pallas_call(
        kernel,
        grid=grid,
        in_specs=[pl.BlockSpec((tm_eff, D), lambda i: (i, 0))]
                 + [full_spec(a) for a in weights],
        out_specs=pl.BlockSpec((tm_eff, Lp), lambda i: (i, 0)),
        out_shape=jax.ShapeDtypeStruct((BN_pad, Lp), jnp.float32),
        compiler_params=pltpu.CompilerParams(
            dimension_semantics=("parallel",),
            vmem_limit_bytes=32 * 1024 * 1024),
        cost_estimate=pl.CostEstimate(flops=int(flops), transcendentals=0,
                                      bytes_accessed=int(bytes_accessed)),
    )(x2, *weights)

    # Compact slab: mode m lives at lanes [m*(F2+1), m*(F2+1)+F2].
    packed = out[:BN, :k * F2p1].reshape(B, N, k, F2p1)
    loc = packed[..., :F2].reshape(B, N, k, future_steps, 2)
    pi = packed[..., F2]
    return loc, pi


# ---------------------------------------------------------------------------
# Parameter init (mirrors the PyTorch module's init)
# ---------------------------------------------------------------------------
def init_params(key, embed_dim, future_steps, k):
    D = embed_dim
    H = 256
    F2 = future_steps * 2
    keys = jax.random.split(key, 7)

    # nn.init.orthogonal_ on (k, D): orthonormal rows (k <= D assumed here).
    a = jax.random.normal(keys[0], (D, k), dtype=jnp.float32)
    q, r = jnp.linalg.qr(a)
    q = q * jnp.sign(jnp.diagonal(r))[None, :]
    mode_embed = q.T.astype(jnp.float32)      # (k, D)

    def linear(key, fan_in, fan_out):
        kw, kb = jax.random.split(key)
        bound = 1.0 / jnp.sqrt(float(fan_in))
        w = jax.random.uniform(kw, (fan_in, fan_out), minval=-bound, maxval=bound,
                               dtype=jnp.float32)
        b = jax.random.uniform(kb, (1, fan_out), minval=-bound, maxval=bound,
                               dtype=jnp.float32)
        return w, b

    w1l, b1l = linear(keys[1], D, H)
    w2l, b2l = linear(keys[2], H, D)
    w3l, b3l = linear(keys[3], D, F2)
    w1p, b1p = linear(keys[4], D, H)
    w2p, b2p = linear(keys[5], H, D)
    w3p, b3p = linear(keys[6], D, 1)

    return dict(mode_embed=mode_embed,
                w1l=w1l, b1l=b1l, w2l=w2l, b2l=b2l, w3l=w3l, b3l=b3l,
                w1p=w1p, b1p=b1p, w2p=w2p, b2p=b2p, w3p=w3p, b3p=b3p)


def _reference_forward(x, params, k, future_steps):
    """Pure-JAX reference mirroring the PyTorch module."""
    B, N, D = x.shape
    xk = x[:, :, None, :] + params["mode_embed"][None, None, :, :]

    def mlp(z, w1, b1, w2, b2, w3, b3):
        z = jnp.maximum(z @ w1 + b1[0], 0.0)
        z = jnp.maximum(z @ w2 + b2[0], 0.0)
        return z @ w3 + b3[0]

    loc = mlp(xk, params["w1l"], params["b1l"], params["w2l"], params["b2l"],
              params["w3l"], params["b3l"]).reshape(B, N, k, future_steps, 2)
    pi = mlp(xk, params["w1p"], params["b1p"], params["w2p"], params["b2p"],
             params["w3p"], params["b3p"])[..., 0]
    return loc, pi


if __name__ == "__main__":
    B, N = 2, 4          # batch, agents/tokens
    D = 32               # embed_dim
    FUT = 8              # future_steps
    K = 6                # number of modes

    key = jax.random.PRNGKey(0)
    kx, kp = jax.random.split(key)
    x = jax.random.normal(kx, (B, N, D), dtype=jnp.float32)
    params = init_params(kp, D, FUT, K)

    loc_ref, pi_ref = _reference_forward(x, params, K, FUT)

    # --- float32 path: tight check against the reference -------------------
    loc, pi = multimodal_decoder_forward(x, params, K, FUT,
                                         compute_dtype=jnp.float32)
    jax.block_until_ready((loc, pi))
    assert loc.shape == (B, N, K, FUT, 2)
    assert pi.shape == (B, N, K)
    assert jnp.allclose(loc, loc_ref, atol=1e-4, rtol=1e-4)
    assert jnp.allclose(pi, pi_ref, atol=1e-4, rtol=1e-4)

    # --- bf16 matmul path (perf option on all generations): loose check -----
    loc_bf, pi_bf = multimodal_decoder_forward(x, params, K, FUT,
                                               compute_dtype=jnp.bfloat16)
    jax.block_until_ready((loc_bf, pi_bf))
    assert jnp.allclose(loc_bf, loc_ref, atol=1e-1, rtol=1e-1)
    assert jnp.allclose(pi_bf, pi_ref, atol=1e-1, rtol=1e-1)

    print("KERNEL_OK")
</pallas_src>

<mosaic_0001>
module attributes {stable_mosaic.version = 11 : i64} {
  func.func @decoder_kernel(%arg0: i32, %arg1: memref<8x32xf32, #tpu.memory_space<vmem>>, %arg2: memref<32x512xf32, #tpu.memory_space<vmem>>, %arg3: memref<6x512xf32, #tpu.memory_space<vmem>>, %arg4: memref<512x128xf32, #tpu.memory_space<vmem>>, %arg5: memref<1x128xf32, #tpu.memory_space<vmem>>, %arg6: memref<6x128x128xf32, #tpu.memory_space<vmem>>, %arg7: memref<1x128xf32, #tpu.memory_space<vmem>>, %arg8: memref<8x128xf32, #tpu.memory_space<vmem>>) attributes {dimension_semantics = [#tpu.dimension_semantics<parallel>], iteration_bounds = array<i64: 1>, scalar_prefetch = 0 : i64, scratch_operands = 0 : i64, tpu.core_type = #tpu.core_type<tc>, window_params = [{transform_indices = @transform_0, window_bounds = array<i64: 8, 32>}, {pipeline_mode = #tpu.pipeline_mode<synchronous>, transform_indices = @transform_1, window_bounds = array<i64: 32, 512>}, {pipeline_mode = #tpu.pipeline_mode<synchronous>, transform_indices = @transform_2, window_bounds = array<i64: 6, 512>}, {pipeline_mode = #tpu.pipeline_mode<synchronous>, transform_indices = @transform_3, window_bounds = array<i64: 512, 128>}, {pipeline_mode = #tpu.pipeline_mode<synchronous>, transform_indices = @transform_4, window_bounds = array<i64: 1, 128>}, {pipeline_mode = #tpu.pipeline_mode<synchronous>, transform_indices = @transform_5, window_bounds = array<i64: 6, 128, 128>}, {pipeline_mode = #tpu.pipeline_mode<synchronous>, transform_indices = @transform_6, window_bounds = array<i64: 1, 128>}, {transform_indices = @transform_7, window_bounds = array<i64: 8, 128>}]} {
    %c0 = arith.constant 0 : index
    %c0_0 = arith.constant 0 : index
    %0 = vector.load %arg1[%c0, %c0_0] : memref<8x32xf32, #tpu.memory_space<vmem>>, vector<8x32xf32>
    %c0_1 = arith.constant 0 : index
    %c0_2 = arith.constant 0 : index
    %1 = vector.load %arg2[%c0_1, %c0_2] : memref<32x512xf32, #tpu.memory_space<vmem>>, vector<32x512xf32>
    %cst = arith.constant dense<0.000000e+00> : vector<8x512xf32>
    %2 = tpu.matmul %0, %1, %cst {dimension_numbers = #tpu.dot_dimension_numbers<[1], [0], [0], [1], [0, 0, 1, 1], [], []>} : vector<8x32xf32>, vector<32x512xf32>, vector<8x512xf32> -> vector<8x512xf32>
    %c0_3 = arith.constant 0 : index
    %c0_4 = arith.constant 0 : index
    %3 = vector.load %arg3[%c0_3, %c0_4] : memref<6x512xf32, #tpu.memory_space<vmem>>, vector<6x512xf32>
    %4 = vector.shape_cast %2 : vector<8x512xf32> to vector<1x8x512xf32>
    %5 = vector.shape_cast %3 : vector<6x512xf32> to vector<6x1x512xf32>
    %6 = vector.broadcast %4 : vector<1x8x512xf32> to vector<6x8x512xf32>
    %7 = vector.broadcast %5 : vector<6x1x512xf32> to vector<6x8x512xf32>
    %8 = arith.addf %6, %7 : vector<6x8x512xf32>
    %cst_5 = arith.constant 0.000000e+00 : f32
    %9 = vector.broadcast %cst_5 : f32 to vector<6x8x512xf32>
    %10 = arith.maximumf %8, %9 : vector<6x8x512xf32>
    %11 = vector.shape_cast %10 : vector<6x8x512xf32> to vector<48x512xf32>
    %c0_6 = arith.constant 0 : index
    %c0_7 = arith.constant 0 : index
    %12 = vector.load %arg4[%c0_6, %c0_7] : memref<512x128xf32, #tpu.memory_space<vmem>>, vector<512x128xf32>
    %cst_8 = arith.constant dense<0.000000e+00> : vector<48x128xf32>
    %13 = tpu.matmul %11, %12, %cst_8 {dimension_numbers = #tpu.dot_dimension_numbers<[1], [0], [0], [1], [0, 0, 1, 1], [], []>} : vector<48x512xf32>, vector<512x128xf32>, vector<48x128xf32> -> vector<48x128xf32>
    %c0_9 = arith.constant 0 : index
    %c0_10 = arith.constant 0 : index
    %14 = vector.load %arg5[%c0_9, %c0_10] : memref<1x128xf32, #tpu.memory_space<vmem>>, vector<1x128xf32>
    %15 = vector.broadcast %14 : vector<1x128xf32> to vector<48x128xf32>
    %16 = arith.addf %13, %15 : vector<48x128xf32>
    %cst_11 = arith.constant 0.000000e+00 : f32
    %17 = vector.broadcast %cst_11 : f32 to vector<48x128xf32>
    %18 = arith.maximumf %16, %17 : vector<48x128xf32>
    %cst_12 = arith.constant 0.000000e+00 : f32
    %19 = vector.broadcast %cst_12 : f32 to vector<8x128xf32>
    %20 = vector.extract_strided_slice %18 {offsets = [0, 0], sizes = [8, 128], strides = [1, 1]} : vector<48x128xf32> to vector<8x128xf32>
    %c0_13 = arith.constant 0 : index
    %c0_14 = arith.constant 0 : index
    %c0_15 = arith.constant 0 : index
    %21 = vector.load %arg6[%c0_13, %c0_14, %c0_15] : memref<6x128x128xf32, #tpu.memory_space<vmem>>, vector<1x128x128xf32>
    %22 = vector.shape_cast %21 : vector<1x128x128xf32> to vector<128x128xf32>
    %cst_16 = arith.constant dense<0.000000e+00> : vector<8x128xf32>
    %23 = tpu.matmul %20, %22, %cst_16 {dimension_numbers = #tpu.dot_dimension_numbers<[1], [0], [0], [1], [0, 0, 1, 1], [], []>} : vector<8x128xf32>, vector<128x128xf32>, vector<8x128xf32> -> vector<8x128xf32>
    %24 = arith.addf %19, %23 : vector<8x128xf32>
    %25 = vector.extract_strided_slice %18 {offsets = [8, 0], sizes = [8, 128], strides = [1, 1]} : vector<48x128xf32> to vector<8x128xf32>
    %c1 = arith.constant 1 : index
    %c0_17 = arith.constant 0 : index
    %c0_18 = arith.constant 0 : index
    %26 = vector.load %arg6[%c1, %c0_17, %c0_18] : memref<6x128x128xf32, #tpu.memory_space<vmem>>, vector<1x128x128xf32>
    %27 = vector.shape_cast %26 : vector<1x128x128xf32> to vector<128x128xf32>
    %cst_19 = arith.constant dense<0.000000e+00> : vector<8x128xf32>
    %28 = tpu.matmul %25, %27, %cst_19 {dimension_numbers = #tpu.dot_dimension_numbers<[1], [0], [0], [1], [0, 0, 1, 1], [], []>} : vector<8x128xf32>, vector<128x128xf32>, vector<8x128xf32> -> vector<8x128xf32>
    %29 = arith.addf %24, %28 : vector<8x128xf32>
    %30 = vector.extract_strided_slice %18 {offsets = [16, 0], sizes = [8, 128], strides = [1, 1]} : vector<48x128xf32> to vector<8x128xf32>
    %c2 = arith.constant 2 : index
    %c0_20 = arith.constant 0 : index
    %c0_21 = arith.constant 0 : index
    %31 = vector.load %arg6[%c2, %c0_20, %c0_21] : memref<6x128x128xf32, #tpu.memory_space<vmem>>, vector<1x128x128xf32>
    %32 = vector.shape_cast %31 : vector<1x128x128xf32> to vector<128x128xf32>
    %cst_22 = arith.constant dense<0.000000e+00> : vector<8x128xf32>
    %33 = tpu.matmul %30, %32, %cst_22 {dimension_numbers = #tpu.dot_dimension_numbers<[1], [0], [0], [1], [0, 0, 1, 1], [], []>} : vector<8x128xf32>, vector<128x128xf32>, vector<8x128xf32> -> vector<8x128xf32>
    %34 = arith.addf %29, %33 : vector<8x128xf32>
    %35 = vector.extract_strided_slice %18 {offsets = [24, 0], sizes = [8, 128], strides = [1, 1]} : vector<48x128xf32> to vector<8x128xf32>
    %c3 = arith.constant 3 : index
    %c0_23 = arith.constant 0 : index
    %c0_24 = arith.constant 0 : index
    %36 = vector.load %arg6[%c3, %c0_23, %c0_24] : memref<6x128x128xf32, #tpu.memory_space<vmem>>, vector<1x128x128xf32>
    %37 = vector.shape_cast %36 : vector<1x128x128xf32> to vector<128x128xf32>
    %cst_25 = arith.constant dense<0.000000e+00> : vector<8x128xf32>
    %38 = tpu.matmul %35, %37, %cst_25 {dimension_numbers = #tpu.dot_dimension_numbers<[1], [0], [0], [1], [0, 0, 1, 1], [], []>} : vector<8x128xf32>, vector<128x128xf32>, vector<8x128xf32> -> vector<8x128xf32>
    %39 = arith.addf %34, %38 : vector<8x128xf32>
    %40 = vector.extract_strided_slice %18 {offsets = [32, 0], sizes = [8, 128], strides = [1, 1]} : vector<48x128xf32> to vector<8x128xf32>
    %c4 = arith.constant 4 : index
    %c0_26 = arith.constant 0 : index
    %c0_27 = arith.constant 0 : index
    %41 = vector.load %arg6[%c4, %c0_26, %c0_27] : memref<6x128x128xf32, #tpu.memory_space<vmem>>, vector<1x128x128xf32>
    %42 = vector.shape_cast %41 : vector<1x128x128xf32> to vector<128x128xf32>
    %cst_28 = arith.constant dense<0.000000e+00> : vector<8x128xf32>
    %43 = tpu.matmul %40, %42, %cst_28 {dimension_numbers = #tpu.dot_dimension_numbers<[1], [0], [0], [1], [0, 0, 1, 1], [], []>} : vector<8x128xf32>, vector<128x128xf32>, vector<8x128xf32> -> vector<8x128xf32>
    %44 = arith.addf %39, %43 : vector<8x128xf32>
    %45 = vector.extract_strided_slice %18 {offsets = [40, 0], sizes = [8, 128], strides = [1, 1]} : vector<48x128xf32> to vector<8x128xf32>
    %c5 = arith.constant 5 : index
    %c0_29 = arith.constant 0 : index
    %c0_30 = arith.constant 0 : index
    %46 = vector.load %arg6[%c5, %c0_29, %c0_30] : memref<6x128x128xf32, #tpu.memory_space<vmem>>, vector<1x128x128xf32>
    %47 = vector.shape_cast %46 : vector<1x128x128xf32> to vector<128x128xf32>
    %cst_31 = arith.constant dense<0.000000e+00> : vector<8x128xf32>
    %48 = tpu.matmul %45, %47, %cst_31 {dimension_numbers = #tpu.dot_dimension_numbers<[1], [0], [0], [1], [0, 0, 1, 1], [], []>} : vector<8x128xf32>, vector<128x128xf32>, vector<8x128xf32> -> vector<8x128xf32>
    %49 = arith.addf %44, %48 : vector<8x128xf32>
    %c0_32 = arith.constant 0 : index
    %c0_33 = arith.constant 0 : index
    %50 = vector.load %arg7[%c0_32, %c0_33] : memref<1x128xf32, #tpu.memory_space<vmem>>, vector<1x128xf32>
    %51 = vector.broadcast %50 : vector<1x128xf32> to vector<8x128xf32>
    %52 = arith.addf %49, %51 : vector<8x128xf32>
    %c0_34 = arith.constant 0 : index
    %c0_35 = arith.constant 0 : index
    %53 = vector.load %arg8[%c0_34, %c0_35] : memref<8x128xf32, #tpu.memory_space<vmem>>, vector<8x128xf32>
    tpu.vector_store %arg8[%c0_34, %c0_35], %52 {strides = array<i32>} : memref<8x128xf32, #tpu.memory_space<vmem>>, vector<8x128xf32>,
    return
  }
  func.func @transform_0(%arg0: i32) -> (i32, i32) {
    %c0_i32 = arith.constant 0 : i32
    %c0_i32_0 = arith.constant 0 : i32
    return %arg0, %c0_i32 : i32, i32
  }
  func.func @transform_1(%arg0: i32) -> (i32, i32) {
    %c0_i32 = arith.constant 0 : i32
    %c0_i32_0 = arith.constant 0 : i32
    %c0_i32_1 = arith.constant 0 : i32
    return %c0_i32, %c0_i32_0 : i32, i32
  }
  func.func @transform_2(%arg0: i32) -> (i32, i32) {
    %c0_i32 = arith.constant 0 : i32
    %c0_i32_0 = arith.constant 0 : i32
    %c0_i32_1 = arith.constant 0 : i32
    return %c0_i32, %c0_i32_0 : i32, i32
  }
  func.func @transform_3(%arg0: i32) -> (i32, i32) {
    %c0_i32 = arith.constant 0 : i32
    %c0_i32_0 = arith.constant 0 : i32
    %c0_i32_1 = arith.constant 0 : i32
    return %c0_i32, %c0_i32_0 : i32, i32
  }
  func.func @transform_4(%arg0: i32) -> (i32, i32) {
    %c0_i32 = arith.constant 0 : i32
    %c0_i32_0 = arith.constant 0 : i32
    %c0_i32_1 = arith.constant 0 : i32
    return %c0_i32, %c0_i32_0 : i32, i32
  }
  func.func @transform_5(%arg0: i32) -> (i32, i32, i32) {
    %c0_i32 = arith.constant 0 : i32
    %c0_i32_0 = arith.constant 0 : i32
    %c0_i32_1 = arith.constant 0 : i32
    %c0_i32_2 = arith.constant 0 : i32
    return %c0_i32, %c0_i32_0, %c0_i32_1 : i32, i32, i32
  }
  func.func @transform_6(%arg0: i32) -> (i32, i32) {
    %c0_i32 = arith.constant 0 : i32
    %c0_i32_0 = arith.constant 0 : i32
    %c0_i32_1 = arith.constant 0 : i32
    return %c0_i32, %c0_i32_0 : i32, i32
  }
  func.func @transform_7(%arg0: i32) -> (i32, i32) {
    %c0_i32 = arith.constant 0 : i32
    %c0_i32_0 = arith.constant 0 : i32
    return %arg0, %c0_i32 : i32, i32
  }
}

</mosaic_0001>

<bundles_post_ra>
// kernel: tpu_custom_call.1
= control target key start
LH: loop header
LB: loop body
LE: loop exit
PB: predicated region body
PF: predicated region fallthrough
CT: control target
= control target key end

     0   :  { %12 = vsyncpa [#allocation3], 0  ;;  %s1136_s0 = inlined_call_operand.hbm [shape: f32[8,32], index: 0, kind: input, shape index: {}]   ;;  %s1137_s1 = inlined_call_operand.hbm [shape: f32[32,512], index: 1, kind: input, shape index: {}]   ;;  %s1138_s2 = inlined_call_operand.hbm [shape: f32[6,512], index: 2, kind: input, shape index: {}]   ;;  %s1139_s3 = inlined_call_operand.hbm [shape: f32[512,128], index: 3, kind: input, shape index: {}]   ;;  %s1140_s4 = inlined_call_operand.vmem [shape: f32[1,128], index: 4, kind: input, shape index: {}]   ;;  %s1141_s5 = inlined_call_operand.hbm [shape: f32[6,128,128], index: 5, kind: input, shape index: {}]   ;;  %s1142_s6 = inlined_call_operand.vmem [shape: f32[1,128], index: 6, kind: input, shape index: {}]   ;;  %s1143_s7 = inlined_call_operand.hbm [shape: f32[8,128], index: 7, kind: output, shape index: {}]  }
   0x1   :  { %13 = vsyncpa [#allocation6], 0 }
   0x2   :  { %14 = vsyncpa [#allocation9], 0  ;;  %s31_s26 = sshll.u32 %s1137_s1, 4  ;;  %s32_s26 = int_to_ptr.hbm [resolvable:$true] %s31_s26 }
   0x3   :  { %15 = vsyncpa [#allocation4], 0  ;;  %s978_s27 = smov [#allocation5]   ;;  %s55_s8 = sshll.u32 %s1139_s3, 4  ;;  %s56_s8 = int_to_ptr.hbm [resolvable:$true] %s55_s8 }
   0x4   :  { %s33_s28 = sshll.u32 %s978_s27, 4  ;;  %s979_s9 = smov 512   ;;  %s34_s28 = int_to_ptr.vmem [resolvable:$true] %s33_s28 }
   0x5   :  { %s980_s10 = smov 32   ;;  %s981_s11 = smov [#allocation8]  }
   0x6   :  { %39 = dma.hbm_to_vmem [thread:$0]  %s32_s26, 2048, %s34_s28, [#allocation6], %s979_s9, %s979_s9, %s980_s10  }
   0x7   :  { %s57_s12 = sshll.u32 %s981_s11, 4  ;;  %s982_s13 = smov 128   ;;  %s58_s12 = int_to_ptr.vmem [resolvable:$true] %s57_s12 }
   0x8   :  { %s983_s14 = smov 8   ;;  %s21_s16 = sshll.u32 %s1136_s0, 4  ;;  %s22_s16 = int_to_ptr.hbm [resolvable:$true] %s21_s16 }
   0x9   :  { %63 = dma.hbm_to_vmem [thread:$0]  %s56_s8, 8192, %s58_s12, [#allocation9], %s982_s13, %s982_s13, %s983_s14  }
   0xa   :  { %s984_s17 = smov [#allocation2]   ;;  %s45_s20 = sshll.u32 %s1138_s2, 4  ;;  %s46_s20 = int_to_ptr.hbm [resolvable:$true] %s45_s20 }
   0xb   :  { %s23_s18 = sshll.u32 %s984_s17, 4  ;;  %s985_s21 = smov [#allocation7]   ;;  %s24_s18 = int_to_ptr.vmem [resolvable:$true] %s23_s18 }
   0xc   :  { %26 = dma.hbm_to_vmem [thread:$0]  %s22_s16, 128, %s24_s18, [#allocation3]  }
   0xd   :  { %s47_s22 = sshll.u32 %s985_s21, 4  ;;  %s70_s25 = sshll.u32 %s1141_s5, 4  ;;  %s48_s22 = int_to_ptr.vmem [resolvable:$true] %s47_s22  ;;  %s71_s25 = int_to_ptr.hbm [resolvable:$true] %s70_s25 }
   0xe   :  { %50 = dma.hbm_to_vmem [thread:$0]  %s46_s20, 512, %s48_s22, [#allocation6]  }
   0xf   :  { %s986_s0 = smov [#allocation10]  }
  0x10   :  { %s72_s26 = sshll.u32 %s986_s0, 4  ;;  %s73_s26 = int_to_ptr.vmem [resolvable:$true] %s72_s26 }
  0x11   :  { %78 = dma.hbm_to_vmem [thread:$0]  %s71_s25, 12288, %s73_s26, [#allocation9], %s982_s13, %s982_s13, %s983_s14  }
  0x12   :  { %970 = dma.done.wait [#allocation3], 128  }
  0x13   :  { %971 = vsyncadd [#allocation3], 4294967168 }
  0x14   :  { %972 = dma.done.wait [#allocation6], 2560  }
  0x15   :  { %973 = vsyncadd [#allocation6], 4294964736 }
  0x16   :  { %974 = dma.done.wait [#allocation9], 20480  }
  0x17   :  { %975 = vsyncadd [#allocation9], 4294946816  ;;  %v114_v0 = vld [vmem:[#allocation5 + $0x60] sm:$0xff]  ;;  %v115_v1 = vld [vmem:[#allocation5 + $0x68] sm:$0xff]  ;;  %vm118_vm0 = vcmask 261120   ;;  %vm213_vm1 = vcmask 1040384  }
  0x18   :  { %v110_v2 = vld [vmem:[#allocation5 + $0x40] sm:$0xff]  ;;  %134 = vmatpush.msra.mxu2 %v114_v0  ;;  %154 = vmatpush.msra.mxu3 %v115_v1  ;;  %v111_v3 = vld [vmem:[#allocation5 + $0x48] sm:$0xff]  ;;  %v101_v8 = vld [vmem:[#allocation2] sm:$0xff]  ;;  %vm219_vm2 = vcmask 1041409   ;;  %vm221_vm3 = vcmask 1043459   ;;  %vm215_vm4 = vcmask 1042434  }
  0x19   :  { %v106_v4 = vld [vmem:[#allocation5 + $0x20] sm:$0xff]  ;;  %v107_v5 = vld [vmem:[#allocation5 + $0x28] sm:$0xff]  ;;  %v361_v9 = vld [vmem:[#allocation8 + $0x78] sm:$0xff]  ;;  %vm217_vm5 = vcmask 1041408   ;;  %vm223_vm6 = vcmask 1042433   ;;  %vm227_vm7 = vcmask 1044484  }
  0x1a   :  { %135 = vmatpush.msra.mxu2 %v110_v2  ;;  %155 = vmatpush.msra.mxu3 %v111_v3  ;;  %v102_v6 = vld [vmem:[#allocation5] sm:$0xff]  ;;  %v103_v7 = vld [vmem:[#allocation5 + $0x8] sm:$0xff]  ;;  %v116_v10 = vld [vmem:[#allocation5 + $0x70] sm:$0xff]  ;;  %vm229_vm8 = vcmask 1043458   ;;  %vm233_vm9 = vcmask 1045509   ;;  %vm235_vm10 = vcmask 1044483  }
  0x1b   :  { %v117_v11 = vld [vmem:[#allocation5 + $0x78] sm:$0xff]  ;;  %414 = vmatpush.msra.mxu0 %v361_v9  ;;  %v360_v13 = vld [vmem:[#allocation8 + $0x70] sm:$0xff]  ;;  %v359_v17 = vld [vmem:[#allocation8 + $0x68] sm:$0xff]  ;;  %vm239_vm11 = vcmask 1046534   ;;  %vm241_vm12 = vcmask 1045508   ;;  %vm245_vm13 = vcmask 1046528  }
  0x1c   :  { %136 = vmatpush.msra.mxu2 %v106_v4  ;;  %156 = vmatpush.msra.mxu3 %v107_v5  ;;  %v377_v12 = vld [vmem:[#allocation8 + $0xf8] sm:$0xff]  ;;  %v112_v14 = vld [vmem:[#allocation5 + $0x50] sm:$0xff]  ;;  %v375_v20 = vld [vmem:[#allocation8 + $0xe8] sm:$0xff]  ;;  %vm247_vm14 = vcmask 1046533   ;;  %s987_s28 = smov [#allocation11]   ;;  %s798_s9 = sshll.u32 %s1143_s7, 4  ;;  %s799_s9 = int_to_ptr.hbm [resolvable:$true] %s798_s9 }
  0x1d   :  { %v113_v15 = vld [vmem:[#allocation5 + $0x58] sm:$0xff]  ;;  %v376_v16 = vld [vmem:[#allocation8 + $0xf0] sm:$0xff]  ;;  %449 = vmatpush.msra.mxu1 %v377_v12  ;;  %415 = vmatpush.msra.mxu0 %v360_v13  ;;  %v358_v21 = vld [vmem:[#allocation8 + $0x60] sm:$0xff]  ;;  %s796_s29 = sshll.u32 %s987_s28, 4  ;;  %s797_s29 = int_to_ptr.vmem [resolvable:$true] %s796_s29 }
  0x1e   :  { %137 = vmatpush.msra.mxu2 %v102_v6  ;;  %157 = vmatpush.msra.mxu3 %v103_v7  ;;  %v108_v18 = vld [vmem:[#allocation5 + $0x30] sm:$0xff]  ;;  %v109_v19 = vld [vmem:[#allocation5 + $0x38] sm:$0xff]  ;;  %v374_v24 = vld [vmem:[#allocation8 + $0xe0] sm:$0xff] }
  0x1f   :  { %810 = vmatmul.msk.f32.vlgmr.msra.gmra.mxu2 %vm118_vm0, %v101_v8  ;;  %811 = vmatmul.msk.f32.vlgmr.msra.gmra.mxu3 %vm118_vm0, %v101_v8  ;;  %v104_v22 = vld [vmem:[#allocation5 + $0x10] sm:$0xff]  ;;  %v105_v23 = vld [vmem:[#allocation5 + $0x18] sm:$0xff]  ;;  %v355_v33 = vld [vmem:[#allocation8 + $0x48] sm:$0xff] }
  0x20   :  { %174 = vmatpush.msrb.mxu2 %v116_v10  ;;  %194 = vmatpush.msrb.mxu3 %v117_v11  ;;  %v357_v25 = vld [vmem:[#allocation8 + $0x58] sm:$0xff]  ;;  %v356_v29 = vld [vmem:[#allocation8 + $0x50] sm:$0xff]  ;;  %v371_v34 = vld [vmem:[#allocation8 + $0xc8] sm:$0xff] }
  0x21   :  { %450 = vmatpush.msra.mxu1 %v376_v16  ;;  %416 = vmatpush.msra.mxu0 %v359_v17  ;;  %v393_v26 = vld [vmem:[#allocation8 + $0x178] sm:$0xff]  ;;  %v392_v30 = vld [vmem:[#allocation8 + $0x170] sm:$0xff]  ;;  %v391_v35 = vld [vmem:[#allocation8 + $0x168] sm:$0xff] }
  0x22   :  { %175 = vmatpush.msrb.mxu2 %v112_v14  ;;  %195 = vmatpush.msrb.mxu3 %v113_v15  ;;  %v409_v27 = vld [vmem:[#allocation8 + $0x1f8] sm:$0xff]  ;;  %v408_v31 = vld [vmem:[#allocation8 + $0x1f0] sm:$0xff]  ;;  %v407_v36 = vld [vmem:[#allocation8 + $0x1e8] sm:$0xff] }
  0x23   :  { %451 = vmatpush.msra.mxu1 %v375_v20  ;;  %417 = vmatpush.msra.mxu0 %v358_v21  ;;  %v373_v28 = vld [vmem:[#allocation8 + $0xd8] sm:$0xff]  ;;  %v372_v32 = vld [vmem:[#allocation8 + $0xd0] sm:$0xff]  ;;  %v354_v37 = vld [vmem:[#allocation8 + $0x40] sm:$0xff] }
  0x24   :  { %176 = vmatpush.msrb.mxu2 %v108_v18  ;;  %196 = vmatpush.msrb.mxu3 %v109_v19  ;;  %v390_v38 = vld [vmem:[#allocation8 + $0x160] sm:$0xff]  ;;  %v353_v41 = vld [vmem:[#allocation8 + $0x38] sm:$0xff]  ;;  %v352_v45 = vld [vmem:[#allocation8 + $0x30] sm:$0xff] }
  0x25   :  { %452 = vmatpush.msra.mxu1 %v374_v24  ;;  %418 = vmatpush.msra.mxu0 %v357_v25  ;;  %v406_v39 = vld [vmem:[#allocation8 + $0x1e0] sm:$0xff]  ;;  %v389_v42 = vld [vmem:[#allocation8 + $0x158] sm:$0xff]  ;;  %v388_v46 = vld [vmem:[#allocation8 + $0x150] sm:$0xff] }
  0x26   :  { %177 = vmatpush.msrb.mxu2 %v104_v22  ;;  %197 = vmatpush.msrb.mxu3 %v105_v23  ;;  %v370_v40 = vld [vmem:[#allocation8 + $0xc0] sm:$0xff]  ;;  %v405_v43 = vld [vmem:[#allocation8 + $0x1d8] sm:$0xff]  ;;  %v404_v47 = vld [vmem:[#allocation8 + $0x1d0] sm:$0xff] }
  0x27   :  { %812 = vmatmul.msk.f32.vlgmr.msrb.gmra.mxu2 %vm118_vm0, %v101_v8  ;;  %813 = vmatmul.msk.f32.vlgmr.msrb.gmra.mxu3 %vm118_vm0, %v101_v8  ;;  %v369_v44 = vld [vmem:[#allocation8 + $0xb8] sm:$0xff]  ;;  %v368_v48 = vld [vmem:[#allocation8 + $0xb0] sm:$0xff]  ;;  %v351_v49 = vld [vmem:[#allocation8 + $0x28] sm:$0xff] }
  0x28   :  { %484 = vmatpush.msra.mxu2 %v393_v26  ;;  %519 = vmatpush.msra.mxu3 %v409_v27  ;;  %v387_v50 = vld [vmem:[#allocation8 + $0x148] sm:$0xff]  ;;  %v350_v53 = vld [vmem:[#allocation8 + $0x20] sm:$0xff]  ;;  %v349_v57 = vld [vmem:[#allocation8 + $0x18] sm:$0xff] }
  0x29   :  { %453 = vmatpush.msra.mxu1 %v373_v28  ;;  %419 = vmatpush.msra.mxu0 %v356_v29  ;;  %v403_v51 = vld [vmem:[#allocation8 + $0x1c8] sm:$0xff]  ;;  %v386_v54 = vld [vmem:[#allocation8 + $0x140] sm:$0xff]  ;;  %v385_v58 = vld [vmem:[#allocation8 + $0x138] sm:$0xff] }
  0x2a   :  { %485 = vmatpush.msra.mxu2 %v392_v30  ;;  %520 = vmatpush.msra.mxu3 %v408_v31  ;;  %v367_v52 = vld [vmem:[#allocation8 + $0xa8] sm:$0xff]  ;;  %v402_v55 = vld [vmem:[#allocation8 + $0x1c0] sm:$0xff]  ;;  %v401_v59 = vld [vmem:[#allocation8 + $0x1b8] sm:$0xff] }
  0x2b   :  { %454 = vmatpush.msra.mxu1 %v372_v32  ;;  %420 = vmatpush.msra.mxu0 %v355_v33  ;;  %v366_v56 = vld [vmem:[#allocation8 + $0xa0] sm:$0xff]  ;;  %v365_v60 = vld [vmem:[#allocation8 + $0x98] sm:$0xff]  ;;  %v348_v61 = vld [vmem:[#allocation8 + $0x10] sm:$0xff] }
  0x2c   :  { %486 = vmatpush.msra.mxu2 %v391_v35  ;;  %521 = vmatpush.msra.mxu3 %v407_v36  ;;  %v364_v62 = vld [vmem:[#allocation8 + $0x90] sm:$0xff]  ;;  %v347_v1 = vld [vmem:[#allocation8 + $0x8] sm:$0xff]  ;;  %v346_v5 = vld [vmem:[#allocation8] sm:$0xff] }
  0x2d   :  { %455 = vmatpush.msra.mxu1 %v371_v34  ;;  %421 = vmatpush.msra.mxu0 %v354_v37  ;;  %v384_v63 = vld [vmem:[#allocation8 + $0x130] sm:$0xff]  ;;  %v363_v2 = vld [vmem:[#allocation8 + $0x88] sm:$0xff]  ;;  %v362_v6 = vld [vmem:[#allocation8 + $0x80] sm:$0xff] }
  0x2e   :  { %487 = vmatpush.msra.mxu2 %v390_v38  ;;  %522 = vmatpush.msra.mxu3 %v406_v39  ;;  %v400_v0 = vld [vmem:[#allocation8 + $0x1b0] sm:$0xff]  ;;  %v383_v3 = vld [vmem:[#allocation8 + $0x128] sm:$0xff]  ;;  %v382_v7 = vld [vmem:[#allocation8 + $0x120] sm:$0xff] }
  0x2f   :  { %456 = vmatpush.msra.mxu1 %v370_v40  ;;  %422 = vmatpush.msra.mxu0 %v353_v41  ;;  %v399_v4 = vld [vmem:[#allocation8 + $0x1a8] sm:$0xff]  ;;  %v398_v8 = vld [vmem:[#allocation8 + $0x1a0] sm:$0xff]  ;;  %v381_v9 = vld [vmem:[#allocation8 + $0x118] sm:$0xff] }
  0x30   :  { %488 = vmatpush.msra.mxu2 %v389_v42  ;;  %523 = vmatpush.msra.mxu3 %v405_v43  ;;  %v397_v10 = vld [vmem:[#allocation8 + $0x198] sm:$0xff]  ;;  %v380_v11 = vld [vmem:[#allocation8 + $0x110] sm:$0xff]  ;;  %v379_v13 = vld [vmem:[#allocation8 + $0x108] sm:$0xff] }
  0x31   :  { %457 = vmatpush.msra.mxu1 %v369_v44  ;;  %423 = vmatpush.msra.mxu0 %v352_v45  ;;  %v396_v12 = vld [vmem:[#allocation8 + $0x190] sm:$0xff]  ;;  %v395_v14 = vld [vmem:[#allocation8 + $0x188] sm:$0xff]  ;;  %v378_v15 = vld [vmem:[#allocation8 + $0x100] sm:$0xff] }
  0x32   :  { %489 = vmatpush.msra.mxu2 %v388_v46  ;;  %524 = vmatpush.msra.mxu3 %v404_v47  ;;  %v394_v16 = vld [vmem:[#allocation8 + $0x180] sm:$0xff]  ;;  %v203_v17 = vld [vmem:[#allocation7 + $0x8] sm:$0x3f]  ;;  %v204_v18 = vld [vmem:[#allocation7 + $0x10] sm:$0x3f] }
  0x33   :  { %458 = vmatpush.msra.mxu1 %v368_v48  ;;  %424 = vmatpush.msra.mxu0 %v351_v49  ;;  %v205_v19 = vld [vmem:[#allocation7 + $0x18] sm:$0x3f]  ;;  %v1047_v20 = vrot.slane %v203_v17, 7  ;;  %v1049_v21 = vrot.slane %v204_v18, 6  ;;  %v1053_v23 = vld [vmem:[#allocation7] sm:$0x3f] }
  0x34   :  { %490 = vmatpush.msra.mxu2 %v387_v50  ;;  %525 = vmatpush.msra.mxu3 %v403_v51  ;;  %v1051_v22 = vrot.slane %v205_v19, 5  ;;  %v575_v17 = vld [vmem:[#allocation10 + $0x78] sm:$0xff]  ;;  %v574_v19 = vld [vmem:[#allocation10 + $0x70] sm:$0xff] }
  0x35   :  { %459 = vmatpush.msra.mxu1 %v367_v52  ;;  %425 = vmatpush.msra.mxu0 %v350_v53  ;;  %v214_v24 = vsel %vm213_vm1, %v1053_v23, %v1047_v20  ;;  %v220_v26 = vsel %vm219_vm2, %v1053_v23, %v1047_v20  ;;  %v226_v35 = vsel %vm215_vm4, %v1053_v23, %v1047_v20  ;;  %v592_v18 = vld [vmem:[#allocation10 + $0xf8] sm:$0xff] }
  0x36   :  { %491 = vmatpush.msra.mxu2 %v386_v54  ;;  %526 = vmatpush.msra.mxu3 %v402_v55  ;;  %v216_v25 = vsel %vm215_vm4, %v1049_v21, %v1051_v22  ;;  %v222_v27 = vsel %vm221_vm3, %v1049_v21, %v1051_v22  ;;  %v228_v36 = vsel %vm227_vm7, %v1049_v21, %v1051_v22 }
  0x37   :  { %460 = vmatpush.msra.mxu1 %v366_v56  ;;  %426 = vmatpush.msra.mxu0 %v349_v57  ;;  %v218_v28 = vsel %vm217_vm5, %v214_v24, %v216_v25  ;;  %v224_v29 = vsel %vm223_vm6, %v220_v26, %v222_v27  ;;  %v230_v43 = vsel %vm229_vm8, %v226_v35, %v228_v36 }
  0x38   :  { %492 = vmatpush.msra.mxu2 %v385_v58  ;;  %527 = vmatpush.msra.mxu3 %v401_v59  ;;  %v250_v30 = vperm.slane %v218_v28, 0  ;;  %v251_v31 = vperm.slane %v218_v28, 1  ;;  %v225_v32 = vrot.slane %v224_v29, 1  ;;  %v252_v44 = vperm.slane %v218_v28, 2 }
  0x39   :  { %461 = vmatpush.msra.mxu1 %v365_v60  ;;  %427 = vmatpush.msra.mxu0 %v348_v61  ;;  %v253_v45 = vperm.slane %v218_v28, 3  ;;  %v231_v46 = vrot.slane %v230_v43, 2  ;;  %v232_v51 = vsel %vm221_vm3, %v1053_v23, %v1047_v20  ;;  %v234_v54 = vsel %vm233_vm9, %v1049_v21, %v1051_v22  ;;  %v591_v28 = vld [vmem:[#allocation10 + $0xf0] sm:$0xff]  ;;  %v588_v43 = vld [vmem:[#allocation10 + $0xd8] sm:$0xff] }
  0x3a   :  { %493 = vmatpush.msra.mxu2 %v384_v63  ;;  %528 = vmatpush.msra.mxu3 %v400_v0  ;;  %v254_v39 = vperm.slane %v225_v32, 0  ;;  %v255_v42 = vperm.slane %v225_v32, 1  ;;  %v256_v61 = vperm.slane %v225_v32, 2  ;;  %v236_v63 = vsel %vm235_vm10, %v232_v51, %v234_v54 }
  0x3b   :  { %462 = vmatpush.msra.mxu1 %v364_v62  ;;  %428 = vmatpush.msra.mxu0 %v347_v1  ;;  %v258_v55 = vperm.slane %v231_v46, 0  ;;  %v259_v56 = vperm.slane %v231_v46, 1  ;;  %v257_v62 = vperm.slane %v225_v32, 3  ;;  %v238_v0 = vsel %vm227_vm7, %v1053_v23, %v1047_v20 }
  0x3c   :  { %494 = vmatpush.msra.mxu2 %v383_v3  ;;  %529 = vmatpush.msra.mxu3 %v399_v4  ;;  %v237_v3 = vrot.slane %v236_v63, 3  ;;  %v240_v4 = vsel %vm239_vm11, %v1049_v21, %v1051_v22  ;;  %v246_v27 = vsel %vm245_vm13, %v1051_v22, %v1049_v21 }
  0x3d   :  { %463 = vmatpush.msra.mxu1 %v363_v2  ;;  %429 = vmatpush.msra.mxu0 %v346_v5 }
  0x3e   :  { %495 = vmatpush.msra.mxu2 %v382_v7  ;;  %530 = vmatpush.msra.mxu3 %v398_v8  ;;  %v242_v7 = vsel %vm241_vm12, %v238_v0, %v240_v4 }
  0x3f   :  { %464 = vmatpush.msra.mxu1 %v362_v6  ;;  %v243_v26 = vrot.slane %v242_v7, 4  ;;  %593 = vmatpush.msrb.mxu0 %v592_v18  ;;  %v570_v7 = vld [vmem:[#allocation10 + $0x50] sm:$0xff] }
  0x40   :  { %496 = vmatpush.msra.mxu2 %v381_v9  ;;  %531 = vmatpush.msra.mxu3 %v397_v10  ;;  %v262_v10 = vperm.slane %v237_v3, 0  ;;  %v566_v18 = vld [vmem:[#allocation10 + $0x30] sm:$0xff] }
  0x41   :  { %613 = vmatpush.msrb.mxu1 %v575_v17  ;;  %594 = vmatpush.msrb.mxu0 %v591_v28  ;;  %v266_v36 = vperm.slane %v243_v26, 0  ;;  %v647_v17 = vld [vmem:[#allocation10 + $0x168] sm:$0xff]  ;;  %v564_v28 = vld [vmem:[#allocation10 + $0x20] sm:$0xff] }
  0x42   :  { %497 = vmatpush.msra.mxu2 %v380_v11  ;;  %532 = vmatpush.msra.mxu3 %v396_v12  ;;  %v263_v11 = vperm.slane %v237_v3, 1 }
  0x43   :  { %614 = vmatpush.msrb.mxu1 %v574_v19  ;;  %v583_v19 = vld [vmem:[#allocation10 + $0xb0] sm:$0xff] }
  0x44   :  { %498 = vmatpush.msra.mxu2 %v379_v13  ;;  %533 = vmatpush.msra.mxu3 %v395_v14  ;;  %v260_v14 = vperm.slane %v231_v46, 2 }
  0x46   :  { %499 = vmatpush.msra.mxu2 %v378_v15  ;;  %534 = vmatpush.msra.mxu3 %v394_v16  ;;  %v261_v15 = vperm.slane %v231_v46, 3  ;;  %v244_v16 = vsel %vm233_vm9, %v1053_v23, %v1047_v20  ;;  %v573_v23 = vld [vmem:[#allocation10 + $0x68] sm:$0xff] }
  0x47   :  { %615 = vmatpush.msrb.mxu1 %v573_v23  ;;  %v645_v23 = vld [vmem:[#allocation10 + $0x158] sm:$0xff] }
  0xa2   :  { %v1064_v33 = vpop.f32.mrf.mxu2  ;;  %v1066_v34 = vpop.f32.mrf.mxu3 }
  0xa3   :  { %v298_v37 = vadd.f32 %v250_v30, %v1064_v33  ;;  %v299_v38 = vadd.f32 %v251_v31, %v1066_v34  ;;  %v302_v47 = vadd.f32 %v254_v39, %v1064_v33  ;;  %v303_v48 = vadd.f32 %v255_v42, %v1066_v34  ;;  %v590_v30 = vld [vmem:[#allocation10 + $0xe8] sm:$0xff]  ;;  %v571_v42 = vld [vmem:[#allocation10 + $0x58] sm:$0xff] }
  0xa4   :  { %v306_v1 = vadd.f32 %v258_v55, %v1064_v33  ;;  %v307_v2 = vadd.f32 %v259_v56, %v1066_v34  ;;  %v310_v24 = vadd.f32 %v262_v10, %v1064_v33  ;;  %v311_v25 = vadd.f32 %v263_v11, %v1066_v34  ;;  %595 = vmatpush.msrb.mxu0 %v590_v30  ;;  %v569_v10 = vld [vmem:[#allocation10 + $0x48] sm:$0xff]  ;;  %v563_v30 = vld [vmem:[#allocation10 + $0x18] sm:$0xff] }
  0xa5   :  { %v322_v40 = vmax.f32 %v298_v37, 0.0  ;;  %v323_v41 = vmax.f32 %v299_v38, 0.0  ;;  %v326_v57 = vmax.f32 %v302_v47, 0.0  ;;  %v327_v58 = vmax.f32 %v303_v48, 0.0  ;;  %v586_v11 = vld [vmem:[#allocation10 + $0xc8] sm:$0xff] }
  0xa6   :  { %v330_v8 = vmax.f32 %v306_v1, 0.0  ;;  %v331_v9 = vmax.f32 %v307_v2, 0.0  ;;  %v248_v31 = vsel %vm247_vm14, %v244_v16, %v246_v27  ;;  %v334_v32 = vmax.f32 %v310_v24, 0.0  ;;  %v584_v16 = vld [vmem:[#allocation10 + $0xb8] sm:$0xff]  ;;  %v685_v24 = vld [vmem:[#allocation10 + $0x1e8] sm:$0xff] }
  0xa7   :  { %430 = vmatmul.f32.vlgmr.msra.gmra.mxu0 %v322_v40  ;;  %465 = vmatmul.f32.vlgmr.msra.gmra.mxu1 %v323_v41  ;;  %v335_v35 = vmax.f32 %v311_v25, 0.0  ;;  %v267_v37 = vperm.slane %v243_v26, 1  ;;  %v264_v38 = vperm.slane %v237_v3, 2  ;;  %v265_v39 = vperm.slane %v237_v3, 3  ;;  %v572_v40 = vld [vmem:[#allocation10 + $0x60] sm:$0xff]  ;;  %v565_v25 = vld [vmem:[#allocation10 + $0x28] sm:$0xff] }
  0xa8   :  { %v589_v41 = vld [vmem:[#allocation10 + $0xe0] sm:$0xff]  ;;  %v249_v46 = vrot.slane %v248_v31, 5  ;;  %616 = vmatpush.msrb.mxu1 %v572_v40  ;;  %v582_v27 = vld [vmem:[#allocation10 + $0xa8] sm:$0xff]  ;;  %v580_v31 = vld [vmem:[#allocation10 + $0x98] sm:$0xff] }
  0xa9   :  { %596 = vmatpush.msrb.mxu0 %v589_v41  ;;  %v560_v40 = vld [vmem:[#allocation10] sm:$0xff] }
  0xaa   :  { %v1077_v49 = vpop.f32.mrf.mxu2  ;;  %v1079_v50 = vpop.f32.mrf.mxu3  ;;  %617 = vmatpush.msrb.mxu1 %v571_v42  ;;  %v271_v54 = vperm.slane %v249_v46, 1  ;;  %v272_v3 = vperm.slane %v249_v46, 2  ;;  %v273_v4 = vperm.slane %v249_v46, 3  ;;  %v642_v41 = vld [vmem:[#allocation10 + $0x140] sm:$0xff] }
  0xab   :  { %v300_v52 = vadd.f32 %v252_v44, %v1077_v49  ;;  %v301_v53 = vadd.f32 %v253_v45, %v1079_v50  ;;  %v304_v5 = vadd.f32 %v256_v61, %v1077_v49  ;;  %v305_v6 = vadd.f32 %v257_v62, %v1079_v50  ;;  %597 = vmatpush.msrb.mxu0 %v588_v43  ;;  %v577_v42 = vld [vmem:[#allocation10 + $0x80] sm:$0xff]  ;;  %v681_v43 = vld [vmem:[#allocation10 + $0x1c8] sm:$0xff] }
  0xac   :  { %v308_v29 = vadd.f32 %v260_v14, %v1077_v49  ;;  %v309_v20 = vadd.f32 %v261_v15, %v1079_v50  ;;  %v314_v44 = vadd.f32 %v266_v36, %v1064_v33  ;;  %v315_v45 = vadd.f32 %v267_v37, %v1066_v34  ;;  %618 = vmatpush.msrb.mxu1 %v570_v7  ;;  %v648_v14 = vld [vmem:[#allocation10 + $0x170] sm:$0xff]  ;;  %v585_v15 = vld [vmem:[#allocation10 + $0xc0] sm:$0xff]  ;;  %v683_v36 = vld [vmem:[#allocation10 + $0x1d8] sm:$0xff] }
  0xad   :  { %v324_v59 = vmax.f32 %v300_v52, 0.0  ;;  %v325_v60 = vmax.f32 %v301_v53, 0.0  ;;  %v328_v12 = vmax.f32 %v304_v5, 0.0  ;;  %v329_v13 = vmax.f32 %v305_v6, 0.0  ;;  %v579_v37 = vld [vmem:[#allocation10 + $0x90] sm:$0xff]  ;;  %v760_v7 = vld [vmem:[#allocation10 + $0x2e0] sm:$0xff] }
  0xae   :  { %v332_v21 = vmax.f32 %v308_v29, 0.0  ;;  %v333_v22 = vmax.f32 %v309_v20, 0.0  ;;  %v312_v47 = vadd.f32 %v264_v38, %v1077_v49  ;;  %v313_v48 = vadd.f32 %v265_v39, %v1079_v50  ;;  %619 = vmatpush.msrb.mxu1 %v569_v10  ;;  %v684_v29 = vld [vmem:[#allocation10 + $0x1e0] sm:$0xff]  ;;  %v682_v38 = vld [vmem:[#allocation10 + $0x1d0] sm:$0xff]  ;;  %v578_v39 = vld [vmem:[#allocation10 + $0x88] sm:$0xff] }
  0xaf   :  { %433 = vmatmul.f32.gmra.mxu0 %v326_v57  ;;  %468 = vmatmul.f32.gmra.mxu1 %v327_v58  ;;  %v338_v51 = vmax.f32 %v314_v44, 0.0  ;;  %v339_v52 = vmax.f32 %v315_v45, 0.0  ;;  %v270_v53 = vperm.slane %v249_v46, 0  ;;  %v268_v57 = vperm.slane %v243_v26, 2  ;;  %v581_v20 = vld [vmem:[#allocation10 + $0xa0] sm:$0xff]  ;;  %v641_v44 = vld [vmem:[#allocation10 + $0x138] sm:$0xff] }
  0xb0   :  { %500 = vmatmul.f32.vlgmr.msra.gmra.mxu2 %v324_v59  ;;  %535 = vmatmul.f32.vlgmr.msra.gmra.mxu3 %v325_v60  ;;  %v336_v55 = vmax.f32 %v312_v47, 0.0  ;;  %v337_v56 = vmax.f32 %v313_v48, 0.0  ;;  %v269_v58 = vperm.slane %v243_v26, 3  ;;  %v319_v60 = vadd.f32 %v271_v54, %v1066_v34  ;;  %v646_v26 = vld [vmem:[#allocation10 + $0x160] sm:$0xff]  ;;  %v725_v45 = vld [vmem:[#allocation10 + $0x278] sm:$0xff]  ;;  %v640_v46 = vld [vmem:[#allocation10 + $0x130] sm:$0xff] }
  0xb1   :  { %v318_v59 = vadd.f32 %v270_v53, %v1064_v33  ;;  %v316_v61 = vadd.f32 %v268_v57, %v1077_v49  ;;  %v320_v5 = vadd.f32 %v272_v3, %v1077_v49  ;;  %v321_v33 = vadd.f32 %v273_v4, %v1079_v50  ;;  %v686_v49 = vld [vmem:[#allocation10 + $0x1f0] sm:$0xff]  ;;  %v680_v48 = vld [vmem:[#allocation10 + $0x1c0] sm:$0xff]  ;;  %v679_v53 = vld [vmem:[#allocation10 + $0x1b8] sm:$0xff] }
  0xb2   :  { %v317_v62 = vadd.f32 %v269_v58, %v1079_v50  ;;  %v343_v0 = vmax.f32 %v319_v60, 0.0  ;;  %v567_v50 = vld [vmem:[#allocation10 + $0x38] sm:$0xff]  ;;  %v724_v47 = vld [vmem:[#allocation10 + $0x270] sm:$0xff]  ;;  %v638_v54 = vld [vmem:[#allocation10 + $0x120] sm:$0xff] }
  0xb3   :  { %v342_v63 = vmax.f32 %v318_v59, 0.0  ;;  %v340_v1 = vmax.f32 %v316_v61, 0.0  ;;  %v344_v6 = vmax.f32 %v320_v5, 0.0  ;;  %v345_v34 = vmax.f32 %v321_v33, 0.0  ;;  %v637_v57 = vld [vmem:[#allocation10 + $0x118] sm:$0xff]  ;;  %v678_v61 = vld [vmem:[#allocation10 + $0x1b0] sm:$0xff] }
  0xb4   :  { %v341_v2 = vmax.f32 %v317_v62, 0.0  ;;  %v721_v58 = vld [vmem:[#allocation10 + $0x258] sm:$0xff]  ;;  %v636_v62 = vld [vmem:[#allocation10 + $0x110] sm:$0xff]  ;;  %v635_v3 = vld [vmem:[#allocation10 + $0x108] sm:$0xff] }
  0xb5   :  { %v763_v59 = vld [vmem:[#allocation10 + $0x2f8] sm:$0xff]  ;;  %v719_v4 = vld [vmem:[#allocation10 + $0x248] sm:$0xff]  ;;  %v634_v33 = vld [vmem:[#allocation10 + $0x100] sm:$0xff] }
  0xb6   :  { %v761_v5 = vld [vmem:[#allocation10 + $0x2e8] sm:$0xff]  ;;  %v717_v10 = vld [vmem:[#allocation10 + $0x238] sm:$0xff] }
  0xb7   :  { %436 = vmatmul.f32.gmra.mxu0 %v330_v8  ;;  %471 = vmatmul.f32.gmra.mxu1 %v331_v9  ;;  %v587_v8 = vld [vmem:[#allocation10 + $0xd0] sm:$0xff]  ;;  %v649_v9 = vld [vmem:[#allocation10 + $0x178] sm:$0xff] }
  0xb8   :  { %503 = vmatmul.f32.gmra.mxu2 %v328_v12  ;;  %538 = vmatmul.f32.gmra.mxu3 %v329_v13  ;;  %v687_v12 = vld [vmem:[#allocation10 + $0x1f8] sm:$0xff]  ;;  %v568_v13 = vld [vmem:[#allocation10 + $0x40] sm:$0xff] }
  0xb9   :  { %598 = vmatpush.msrb.mxu0 %v587_v8  ;;  %650 = vmatpush.msrb.mxu2 %v649_v9  ;;  %v675_v9 = vld [vmem:[#allocation10 + $0x198] sm:$0xff] }
  0xba   :  { %688 = vmatpush.msrb.mxu3 %v687_v12  ;;  %620 = vmatpush.msrb.mxu1 %v568_v13  ;;  %v674_v13 = vld [vmem:[#allocation10 + $0x190] sm:$0xff] }
  0xbb   :  { %599 = vmatpush.msrb.mxu0 %v586_v11  ;;  %651 = vmatpush.msrb.mxu2 %v648_v14  ;;  %v759_v11 = vld [vmem:[#allocation10 + $0x2d8] sm:$0xff]  ;;  %v716_v14 = vld [vmem:[#allocation10 + $0x230] sm:$0xff] }
  0xbc   :  { %689 = vmatpush.msrb.mxu3 %v686_v49  ;;  %621 = vmatpush.msrb.mxu1 %v567_v50  ;;  %v673_v50 = vld [vmem:[#allocation10 + $0x188] sm:$0xff] }
  0xbd   :  { %600 = vmatpush.msrb.mxu0 %v585_v15  ;;  %652 = vmatpush.msrb.mxu2 %v647_v17  ;;  %v758_v15 = vld [vmem:[#allocation10 + $0x2d0] sm:$0xff]  ;;  %v757_v17 = vld [vmem:[#allocation10 + $0x2c8] sm:$0xff] }
  0xbe   :  { %622 = vmatpush.msrb.mxu1 %v566_v18  ;;  %690 = vmatpush.msrb.mxu3 %v685_v24  ;;  %v672_v18 = vld [vmem:[#allocation10 + $0x180] sm:$0xff] }
  0xbf   :  { %439 = vmatmul.f32.gmra.mxu0 %v334_v32  ;;  %474 = vmatmul.f32.gmra.mxu1 %v335_v35  ;;  %v562_v32 = vld [vmem:[#allocation10 + $0x10] sm:$0xff]  ;;  %v714_v24 = vld [vmem:[#allocation10 + $0x220] sm:$0xff] }
  0xc0   :  { %506 = vmatmul.f32.gmra.mxu2 %v332_v21  ;;  %541 = vmatmul.f32.gmra.mxu3 %v333_v22  ;;  %v644_v35 = vld [vmem:[#allocation10 + $0x150] sm:$0xff]  ;;  %v561_v21 = vld [vmem:[#allocation10 + $0x8] sm:$0xff] }
  0xc1   :  { %601 = vmatpush.msrb.mxu0 %v584_v16  ;;  %653 = vmatpush.msrb.mxu2 %v646_v26  ;;  %v643_v22 = vld [vmem:[#allocation10 + $0x148] sm:$0xff] }
  0xc2   :  { %623 = vmatpush.msrb.mxu1 %v565_v25  ;;  %691 = vmatpush.msrb.mxu3 %v684_v29  ;;  %v715_v16 = vld [vmem:[#allocation10 + $0x228] sm:$0xff]  ;;  %v756_v25 = vld [vmem:[#allocation10 + $0x2c0] sm:$0xff] }
  0xc3   :  { %602 = vmatpush.msrb.mxu0 %v583_v19  ;;  %654 = vmatpush.msrb.mxu2 %v645_v23  ;;  %v755_v23 = vld [vmem:[#allocation10 + $0x2b8] sm:$0xff] }
  0xc4   :  { %624 = vmatpush.msrb.mxu1 %v564_v28  ;;  %692 = vmatpush.msrb.mxu3 %v683_v36 }
  0xc5   :  { %603 = vmatpush.msrb.mxu0 %v582_v27  ;;  %655 = vmatpush.msrb.mxu2 %v644_v35  ;;  %v754_v35 = vld [vmem:[#allocation10 + $0x2b0] sm:$0xff] }
  0xc6   :  { %625 = vmatpush.msrb.mxu1 %v563_v30  ;;  %693 = vmatpush.msrb.mxu3 %v682_v38 }
  0xc7   :  { %442 = vmatmul.f32.gmra.mxu0 %v338_v51  ;;  %477 = vmatmul.f32.gmra.mxu1 %v339_v52  ;;  %v639_v51 = vld [vmem:[#allocation10 + $0x128] sm:$0xff] }
  0xc8   :  { %509 = vmatmul.f32.gmra.mxu2 %v336_v55  ;;  %544 = vmatmul.f32.gmra.mxu3 %v337_v56  ;;  %v723_v52 = vld [vmem:[#allocation10 + $0x268] sm:$0xff]  ;;  %v722_v55 = vld [vmem:[#allocation10 + $0x260] sm:$0xff] }
  0xc9   :  { %604 = vmatpush.msrb.mxu0 %v581_v20  ;;  %626 = vmatpush.msrb.mxu1 %v562_v32  ;;  %v713_v20 = vld [vmem:[#allocation10 + $0x218] sm:$0xff]  ;;  %v712_v32 = vld [vmem:[#allocation10 + $0x210] sm:$0xff] }
  0xca   :  { %656 = vmatpush.msrb.mxu2 %v643_v22  ;;  %694 = vmatpush.msrb.mxu3 %v681_v43 }
  0xcb   :  { %605 = vmatpush.msrb.mxu0 %v580_v31  ;;  %627 = vmatpush.msrb.mxu1 %v561_v21  ;;  %v753_v21 = vld [vmem:[#allocation10 + $0x2a8] sm:$0xff] }
  0xcc   :  { %657 = vmatpush.msrb.mxu2 %v642_v41  ;;  %695 = vmatpush.msrb.mxu3 %v680_v48  ;;  %v750_v48 = vld [vmem:[#allocation10 + $0x290] sm:$0xff] }
  0xcd   :  { %606 = vmatpush.msrb.mxu0 %v579_v37  ;;  %628 = vmatpush.msrb.mxu1 %v560_v40  ;;  %v711_v37 = vld [vmem:[#allocation10 + $0x208] sm:$0xff]  ;;  %v752_v40 = vld [vmem:[#allocation10 + $0x2a0] sm:$0xff] }
  0xce   :  { %658 = vmatpush.msrb.mxu2 %v641_v44  ;;  %696 = vmatpush.msrb.mxu3 %v679_v53  ;;  %v751_v44 = vld [vmem:[#allocation10 + $0x298] sm:$0xff] }
  0xcf   :  { %445 = vmatmul.f32.gmra.mxu0 %v342_v63  ;;  %480 = vmatmul.f32.gmra.mxu1 %v343_v0  ;;  %v720_v63 = vld [vmem:[#allocation10 + $0x250] sm:$0xff]  ;;  %v1122_v0 = vld [vmem:[%s1140_s4] ss:$0 sm:$0xff] }
  0xd0   :  { %512 = vmatmul.f32.gmra.mxu2 %v340_v1  ;;  %547 = vmatmul.f32.gmra.mxu3 %v341_v2  ;;  %v762_v1 = vld [vmem:[#allocation10 + $0x2f0] sm:$0xff]  ;;  %v677_v2 = vld [vmem:[#allocation10 + $0x1a8] sm:$0xff] }
  0xd1   :  { %607 = vmatpush.msrb.mxu0 %v578_v39  ;;  %659 = vmatpush.msrb.mxu2 %v640_v46  ;;  %v710_v39 = vld [vmem:[#allocation10 + $0x200] sm:$0xff] }
  0xd2   :  { %764 = vmatpush.msra.mxu1 %v763_v59  ;;  %697 = vmatpush.msrb.mxu3 %v678_v61 }
  0xd3   :  { %608 = vmatpush.msrb.mxu0 %v577_v42  ;;  %660 = vmatpush.msrb.mxu2 %v639_v51 }
  0xd4   :  { %765 = vmatpush.msra.mxu1 %v762_v1  ;;  %698 = vmatpush.msrb.mxu3 %v677_v2 }
  0xd5   :  { %726 = vmatpush.msra.mxu0 %v725_v45  ;;  %661 = vmatpush.msrb.mxu2 %v638_v54  ;;  %v748_v54 = vld [vmem:[#allocation10 + $0x280] sm:$0xff] }
  0xd6   :  { %766 = vmatpush.msra.mxu1 %v761_v5 }
  0xd7   :  { %727 = vmatpush.msra.mxu0 %v724_v47  ;;  %662 = vmatpush.msrb.mxu2 %v637_v57 }
  0xd8   :  { %515 = vmatmul.f32.gmra.mxu2 %v344_v6  ;;  %550 = vmatmul.f32.gmra.mxu3 %v345_v34  ;;  %v676_v6 = vld [vmem:[#allocation10 + $0x1a0] sm:$0xff] }
  0xd9   :  { %728 = vmatpush.msra.mxu0 %v723_v52  ;;  %663 = vmatpush.msrb.mxu2 %v636_v62  ;;  %v718_v34 = vld [vmem:[#allocation10 + $0x240] sm:$0xff]  ;;  %v749_v52 = vld [vmem:[#allocation10 + $0x288] sm:$0xff] }
  0xda   :  { %699 = vmatpush.msrb.mxu3 %v676_v6  ;;  %767 = vmatpush.msra.mxu1 %v760_v7 }
  0xdb   :  { %729 = vmatpush.msra.mxu0 %v722_v55  ;;  %664 = vmatpush.msrb.mxu2 %v635_v3 }
  0xdc   :  { %700 = vmatpush.msrb.mxu3 %v675_v9  ;;  %768 = vmatpush.msra.mxu1 %v759_v11 }
  0xdd   :  { %730 = vmatpush.msra.mxu0 %v721_v58  ;;  %665 = vmatpush.msrb.mxu2 %v634_v33 }
  0xde   :  { %701 = vmatpush.msrb.mxu3 %v674_v13  ;;  %769 = vmatpush.msra.mxu1 %v758_v15 }
  0xdf   :  { %731 = vmatpush.msra.mxu0 %v720_v63 }
  0xe0   :  { %702 = vmatpush.msrb.mxu3 %v673_v50  ;;  %770 = vmatpush.msra.mxu1 %v757_v17 }
  0xe1   :  { %732 = vmatpush.msra.mxu0 %v719_v4 }
  0xe2   :  { %703 = vmatpush.msrb.mxu3 %v672_v18  ;;  %771 = vmatpush.msra.mxu1 %v756_v25 }
  0xe3   :  { %733 = vmatpush.msra.mxu0 %v718_v34 }
  0xe4   :  { %772 = vmatpush.msra.mxu1 %v755_v23  ;;  %v825_v23 = vld [vmem:[%s1142_s6] ss:$0 sm:$0xff] }
  0xe5   :  { %734 = vmatpush.msra.mxu0 %v717_v10 }
  0xe6   :  { %773 = vmatpush.msra.mxu1 %v754_v35 }
  0xe7   :  { %735 = vmatpush.msra.mxu0 %v716_v14 }
  0xe8   :  { %774 = vmatpush.msra.mxu1 %v753_v21 }
  0xe9   :  { %736 = vmatpush.msra.mxu0 %v715_v16 }
  0xea   :  { %775 = vmatpush.msra.mxu1 %v752_v40 }
  0xeb   :  { %737 = vmatpush.msra.mxu0 %v714_v24 }
  0xec   :  { %776 = vmatpush.msra.mxu1 %v751_v44 }
  0xed   :  { %738 = vmatpush.msra.mxu0 %v713_v20 }
  0xee   :  { %777 = vmatpush.msra.mxu1 %v750_v48 }
  0xef   :  { %739 = vmatpush.msra.mxu0 %v712_v32 }
  0xf0   :  { %778 = vmatpush.msra.mxu1 %v749_v52 }
  0xf1   :  { %740 = vmatpush.msra.mxu0 %v711_v37 }
  0xf2   :  { %779 = vmatpush.msra.mxu1 %v748_v54 }
  0xf3   :  { %741 = vmatpush.msra.mxu0 %v710_v39 }
 0x124   :  { %v431_v56 = vpop.f32.mrf.mxu0  ;;  %v466_v60 = vpop.f32.mrf.mxu1 }
 0x125   :  { %v432_v12 = vadd.f32 %v1122_v0, %v431_v56 }
 0x127   :  { %v467_v19 = vadd.f32 %v466_v60, %v432_v12 }
 0x12c   :  { %v434_v8 = vpop.f32.mrf.mxu0  ;;  %v469_v49 = vpop.f32.mrf.mxu1 }
 0x12d   :  { %v435_v30 = vadd.f32 %v1122_v0, %v434_v8 }
 0x12f   :  { %v470_v22 = vadd.f32 %v469_v49, %v435_v30 }
 0x133   :  { %v501_v26 = vpop.f32.mrf.mxu2  ;;  %v536_v27 = vpop.f32.mrf.mxu3 }
 0x134   :  { %v502_v28 = vadd.f32 %v501_v26, %v467_v19  ;;  %v437_v29 = vpop.f32.mrf.mxu0  ;;  %v472_v38 = vpop.f32.mrf.mxu1 }
 0x135   :  { %v438_v45 = vadd.f32 %v1122_v0, %v437_v29 }
 0x136   :  { %v537_v31 = vadd.f32 %v536_v27, %v502_v28 }
 0x137   :  { %v473_v53 = vadd.f32 %v472_v38, %v438_v45 }
 0x138   :  { %v554_v36 = vmax.f32 %v537_v31, 0.0 }
 0x13a   :  { %629 = vmatmul.f32.vlgmr.msrb.gmra.mxu1 %v554_v36 }
 0x13b   :  { %v504_v41 = vpop.f32.mrf.mxu2  ;;  %v539_v42 = vpop.f32.mrf.mxu3 }
 0x13c   :  { %v505_v43 = vadd.f32 %v504_v41, %v470_v22  ;;  %v440_v47 = vpop.f32.mrf.mxu0  ;;  %v475_v58 = vpop.f32.mrf.mxu1 }
 0x13d   :  { %v441_v59 = vadd.f32 %v1122_v0, %v440_v47 }
 0x13e   :  { %v540_v46 = vadd.f32 %v539_v42, %v505_v43 }
 0x13f   :  { %v476_v63 = vadd.f32 %v475_v58, %v441_v59 }
 0x140   :  { %v555_v51 = vmax.f32 %v540_v46, 0.0 }
 0x142   :  { %609 = vmatmul.f32.vlgmr.msrb.gmra.mxu0 %v555_v51 }
 0x143   :  { %v507_v55 = vpop.f32.mrf.mxu2  ;;  %v542_v56 = vpop.f32.mrf.mxu3 }
 0x144   :  { %v508_v57 = vadd.f32 %v507_v55, %v473_v53  ;;  %v443_v62 = vpop.f32.mrf.mxu0  ;;  %v478_v33 = vpop.f32.mrf.mxu1 }
 0x145   :  { %v444_v4 = vadd.f32 %v1122_v0, %v443_v62 }
 0x146   :  { %v543_v60 = vadd.f32 %v542_v56, %v508_v57 }
 0x147   :  { %v479_v34 = vadd.f32 %v478_v33, %v444_v4 }
 0x148   :  { %v556_v61 = vmax.f32 %v543_v60, 0.0 }
 0x14a   :  { %666 = vmatmul.f32.vlgmr.msrb.gmra.mxu2 %v556_v61 }
 0x14b   :  { %v510_v1 = vpop.f32.mrf.mxu2  ;;  %v545_v2 = vpop.f32.mrf.mxu3 }
 0x14c   :  { %v511_v3 = vadd.f32 %v510_v1, %v476_v63  ;;  %v446_v7 = vpop.f32.mrf.mxu0  ;;  %v481_v14 = vpop.f32.mrf.mxu1 }
 0x14d   :  { %v447_v11 = vadd.f32 %v1122_v0, %v446_v7 }
 0x14e   :  { %v546_v5 = vadd.f32 %v545_v2, %v511_v3 }
 0x14f   :  { %v482_v15 = vadd.f32 %v481_v14, %v447_v11 }
 0x150   :  { %v557_v6 = vmax.f32 %v546_v5, 0.0 }
 0x152   :  { %704 = vmatmul.f32.vlgmr.msrb.gmra.mxu3 %v557_v6 }
 0x153   :  { %v513_v8 = vpop.f32.mrf.mxu2  ;;  %v548_v9 = vpop.f32.mrf.mxu3 }
 0x154   :  { %v514_v10 = vadd.f32 %v513_v8, %v479_v34 }
 0x156   :  { %v549_v12 = vadd.f32 %v548_v9, %v514_v10 }
 0x158   :  { %v558_v13 = vmax.f32 %v549_v12, 0.0 }
 0x15a   :  { %742 = vmatmul.f32.vlgmr.msra.gmra.mxu0 %v558_v13 }
 0x15b   :  { %v516_v49 = vpop.f32.mrf.mxu2  ;;  %v551_v16 = vpop.f32.mrf.mxu3 }
 0x15c   :  { %v517_v50 = vadd.f32 %v516_v49, %v482_v15 }
 0x15e   :  { %v552_v17 = vadd.f32 %v551_v16, %v517_v50 }
 0x160   :  { %v559_v18 = vmax.f32 %v552_v17, 0.0 }
 0x162   :  { %780 = vmatmul.f32.vlgmr.msra.gmra.mxu1 %v559_v18 }
 0x1b7   :  { %v630_v24 = vpop.f32.mrf.mxu1 }
 0x1bf   :  { %v610_v19 = vpop.f32.mrf.mxu0 }
 0x1c0   :  { %v631_v26 = vadd.f32 %v630_v24, %v610_v19 }
 0x1cd   :  { %v667_v25 = vpop.f32.mrf.mxu2 }
 0x1ce   :  { %v670_v28 = vadd.f32 %v667_v25, %v631_v26 }
 0x1d5   :  { %v705_v27 = vpop.f32.mrf.mxu3 }
 0x1d6   :  { %v708_v29 = vadd.f32 %v705_v27, %v670_v28 }
 0x1d7   :  { %v743_v20 = vpop.f32.mrf.mxu0 }
 0x1d8   :  { %v746_v0 = vadd.f32 %v743_v20, %v708_v29 }
 0x1df   :  { %v781_v30 = vpop.f32.mrf.mxu1 }
 0x1e0   :  { %v784_v31 = vadd.f32 %v781_v30, %v746_v0 }
 0x1e2   :  { %v789_v32 = vadd.f32 %v825_v23, %v784_v31 }
 0x1e4   :  { %790 = vst [vmem:[#allocation11] sm:$0xff] %v789_v32 }
 0x1e5   :  { %801 = dma.vmem_to_hbm [thread:$0]  %s797_s29, 128, %s799_s9, [#allocation4]  }
 0x1e6   :  { %976 = dma.done.wait [#allocation4], 128  }
 0x1e7   :  { %977 = vsyncadd [#allocation4], 4294967168 }
 0x1e8   :  { %806 = vsyncpa [#allocation3], 1 }
 0x1e9   :  { %807 = vsyncpa [#allocation6], 1 }
 0x1ea   :  { %808 = vsyncpa [#allocation9], 1 }
 0x1eb   :  { %809 = vsyncpa [#allocation4], 1 }

</bundles_post_ra>
